<compile_context>
chip_gen: v7x
topology: tpu7x:2x2x1
jax: 0.10.0
libtpu: 0.0.40
codegen_flags: <defaults>
</compile_context>

<pallas_src>
import jax
import jax.numpy as jnp
import numpy as np
from jax.experimental import pallas as pl
from jax.experimental.pallas import tpu as pltpu

_VMEM_LIMIT = 48 * 1024 * 1024  # safe on v5e/v6e (128 MiB) and v7x (64 MiB physical)


def _round_up(x, m):
    return ((x + m - 1) // m) * m


def _pick_tk(kp, max_tk=1024):
    """Largest multiple of 128 that divides kp and is <= max_tk (kp is a multiple of 128)."""
    best = 128
    d = 128
    while d <= min(kp, max_tk):
        if kp % d == 0:
            best = d
        d += 128
    return best


# ---------------- kernel 1: conv matmul + per-block BN partial statistics ----------------
def _conv_stats_kernel(p_ref, w_ref, y_ref, psum_ref, pssq_ref, acc_ref):
    k = pl.program_id(1)

    @pl.when(k == 0)
    def _init():
        acc_ref[...] = jnp.zeros_like(acc_ref)

    # MXU matmul, f32 accumulation (inputs may be bf16).
    acc_ref[...] += jnp.dot(p_ref[...], w_ref[...], preferred_element_type=jnp.float32)

    @pl.when(k == pl.num_programs(1) - 1)
    def _finalize():
        y = acc_ref[...]
        y_ref[...] = y.astype(y_ref.dtype)
        # No bias was added, so zero-padded M rows are exactly zero and need no mask.
        psum_ref[...] = jnp.sum(y, axis=0, keepdims=True).reshape(psum_ref.shape)
        pssq_ref[...] = jnp.sum(y * y, axis=0, keepdims=True).reshape(pssq_ref.shape)


# ---------------- kernel 2: BN affine + LeakyReLU(0.2) ----------------
def _bn_lrelu_kernel(y_ref, scale_ref, shift_ref, o_ref):
    z = y_ref[...].astype(jnp.float32) * scale_ref[...] + shift_ref[...]
    o_ref[...] = jnp.where(z >= 0.0, z, 0.2 * z)


def dcgan_conv_forward(x, w, b, gamma, beta, eps=1e-5, compute_dtype=jnp.bfloat16):
    """x: (N, Cin, H, W) NCHW float32. Returns (N, Cout, H//2, W//2) float32.

    `b` (the Conv2d bias) is accepted for API parity but not used: a conv bias followed by
    train-mode BatchNorm cancels exactly (it shifts the batch mean by the same amount).
    """
    del b
    N, Cin, H, W_sp = x.shape
    Cout = w.shape[0]
    KH = KW = 4
    assert H % 2 == 0 and W_sp % 2 == 0, "dcgan_conv expects even spatial dims"
    Ho, Wo = H // 2, W_sp // 2

    # ---- im2col (plain-JAX glue) ----
    # Pad channels on the small input so KP = KH*KW*Cin_p is lane-aligned; this avoids an
    # extra HBM copy to pad the 4x-larger patch matrix along K.
    Cin_p = _round_up(Cin, 8)
    x_nhwc = jnp.transpose(x, (0, 2, 3, 1))
    if Cin_p != Cin:
        x_nhwc = jnp.pad(x_nhwc, ((0, 0), (0, 0), (0, 0), (0, Cin_p - Cin)))
    x_pad = jnp.pad(x_nhwc, ((0, 0), (1, 1), (1, 1), (0, 0)))

    cols = []
    for kh in range(KH):
        for kw in range(KW):
            cols.append(x_pad[:, kh:kh + 2 * Ho:2, kw:kw + 2 * Wo:2, :])  # (N,Ho,Wo,Cin_p)
    # Natural (kh, kw, cin) K-order: no big transpose of the patch tensor; the small weight
    # tensor is transposed to match instead.
    patches = jnp.stack(cols, axis=3)  # (N, Ho, Wo, KH*KW, Cin_p)

    M = N * Ho * Wo
    KP = KH * KW * Cin_p  # multiple of 128

    # ---- tiling / padding (lane-dense last dims, big M tiles, K grid axis) ----
    TM = min(512, _round_up(M, 128))  # large M tiles (~85% of HBM roofline vs ~29% @128)
    M_pad = _round_up(M, TM)
    TK = _pick_tk(KP)                 # bounds VMEM per grid step for deep layers
    CP = _round_up(Cout, 128)         # lane-dense output -> unmasked vst, full MXU columns

    P = patches.reshape(M, KP).astype(compute_dtype)  # bf16 halves the dominant HBM stream
    if M_pad != M:
        P = jnp.pad(P, ((0, M_pad - M), (0, 0)))

    w_p = jnp.pad(w, ((0, 0), (0, Cin_p - Cin), (0, 0), (0, 0)))          # (Cout,Cin_p,KH,KW)
    Wm = jnp.transpose(w_p, (2, 3, 1, 0)).reshape(KP, Cout).astype(compute_dtype)
    if CP != Cout:
        Wm = jnp.pad(Wm, ((0, 0), (0, CP - Cout)))                        # (KP, CP)

    nM = M_pad // TM
    nK = KP // TK

    # ---- kernel 1: conv matmul + per-M-block channel sums ----
    y, psum, pssq = pl.pallas_call(
        _conv_stats_kernel,
        out_shape=(
            jax.ShapeDtypeStruct((M_pad, CP), compute_dtype),
            jax.ShapeDtypeStruct((nM, 1, CP), jnp.float32),
            jax.ShapeDtypeStruct((nM, 1, CP), jnp.float32),
        ),
        grid_spec=pltpu.PrefetchScalarGridSpec(
            num_scalar_prefetch=0,
            grid=(nM, nK),
            in_specs=[
                pl.BlockSpec((TM, TK), lambda i, k: (i, k)),
                pl.BlockSpec((TK, CP), lambda i, k: (k, 0)),
            ],
            out_specs=(
                pl.BlockSpec((TM, CP), lambda i, k: (i, 0)),
                pl.BlockSpec((1, 1, CP), lambda i, k: (i, 0, 0)),
                pl.BlockSpec((1, 1, CP), lambda i, k: (i, 0, 0)),
            ),
            scratch_shapes=[pltpu.VMEM((TM, CP), jnp.float32)],
        ),
        compiler_params=pltpu.CompilerParams(
            dimension_semantics=("parallel", "arbitrary"),
            vmem_limit_bytes=_VMEM_LIMIT,
        ),
    )(P, Wm)

    # ---- BN statistics (training-mode batch stats, biased variance) ----
    s = jnp.sum(psum, axis=0).reshape(1, CP)
    ss = jnp.sum(pssq, axis=0).reshape(1, CP)
    mean = s / M
    var = jnp.maximum(ss / M - mean * mean, 0.0)  # guard single-pass cancellation
    gamma_p = jnp.pad(gamma.astype(jnp.float32), (0, CP - Cout), constant_values=1.0).reshape(1, CP)
    beta_p = jnp.pad(beta.astype(jnp.float32), (0, CP - Cout)).reshape(1, CP)
    scale = gamma_p / jnp.sqrt(var + eps)
    shift = beta_p - mean * scale

    # ---- kernel 2: affine BN + LeakyReLU(0.2) ----
    TM2 = 1024 if M_pad % 1024 == 0 else TM
    o = pl.pallas_call(
        _bn_lrelu_kernel,
        out_shape=jax.ShapeDtypeStruct((M_pad, CP), jnp.float32),
        grid_spec=pltpu.PrefetchScalarGridSpec(
            num_scalar_prefetch=0,
            grid=(M_pad // TM2,),
            in_specs=[
                pl.BlockSpec((TM2, CP), lambda i: (i, 0)),
                pl.BlockSpec((1, CP), lambda i: (0, 0)),
                pl.BlockSpec((1, CP), lambda i: (0, 0)),
            ],
            out_specs=pl.BlockSpec((TM2, CP), lambda i: (i, 0)),
        ),
        compiler_params=pltpu.CompilerParams(
            dimension_semantics=("parallel",),
            vmem_limit_bytes=_VMEM_LIMIT,
        ),
    )(y, scale, shift)

    out = o[:M, :Cout].reshape(N, Ho, Wo, Cout)
    return jnp.transpose(out, (0, 3, 1, 2))  # back to NCHW


def _reference(x, w, b, gamma, beta, eps=1e-5):
    y = jax.lax.conv_general_dilated(
        x, w, window_strides=(2, 2), padding=((1, 1), (1, 1)),
        dimension_numbers=("NCHW", "OIHW", "NCHW"))
    y = y + b.reshape(1, -1, 1, 1)
    mean = y.mean(axis=(0, 2, 3), keepdims=True)
    var = ((y - mean) ** 2).mean(axis=(0, 2, 3), keepdims=True)
    z = (y - mean) / jnp.sqrt(var + eps)
    z = z * gamma.reshape(1, -1, 1, 1) + beta.reshape(1, -1, 1, 1)
    return jnp.where(z >= 0, z, 0.2 * z)


if __name__ == "__main__":
    N, Cin, H, W = 2, 4, 16, 16
    Cout = 8

    key = jax.random.PRNGKey(0)
    kx, kw, kb, kg, kbt = jax.random.split(key, 5)
    x = jax.random.normal(kx, (N, Cin, H, W), dtype=jnp.float32)
    w = 0.1 * jax.random.normal(kw, (Cout, Cin, 4, 4), dtype=jnp.float32)
    b = 0.05 * jax.random.normal(kb, (Cout,), dtype=jnp.float32)
    gamma = 1.0 + 0.1 * jax.random.normal(kg, (Cout,), dtype=jnp.float32)
    beta = 0.1 * jax.random.normal(kbt, (Cout,), dtype=jnp.float32)

    ref = _reference(x, w, b, gamma, beta)

    # Exact (f32 MXU inputs, f32 intermediate) path: tight tolerance against the reference.
    out_f32 = jax.block_until_ready(
        dcgan_conv_forward(x, w, b, gamma, beta, compute_dtype=jnp.float32))
    np.testing.assert_allclose(np.asarray(out_f32), np.asarray(ref), atol=1e-3, rtol=1e-3)

    # Default fast path (bf16 MXU inputs + bf16 intermediate, f32 accumulation/statistics):
    # tolerance accounts for bf16 quantization only.
    out_bf16 = jax.block_until_ready(dcgan_conv_forward(x, w, b, gamma, beta))
    np.testing.assert_allclose(np.asarray(out_bf16), np.asarray(ref), atol=2e-2, rtol=2e-2)

    print("KERNEL_OK")
</pallas_src>

<mosaic_0001>
module attributes {stable_mosaic.version = 11 : i64} {
  func.func @_conv_stats_kernel(%arg0: i32, %arg1: i32, %arg2: memref<128x128xf32, #tpu.memory_space<vmem>>, %arg3: memref<128x128xf32, #tpu.memory_space<vmem>>, %arg4: memref<128x128xf32, #tpu.memory_space<vmem>>, %arg5: memref<1x1x128xf32, #tpu.memory_space<vmem>>, %arg6: memref<1x1x128xf32, #tpu.memory_space<vmem>>, %arg7: memref<128x128xf32, #tpu.memory_space<vmem>>) attributes {dimension_semantics = [#tpu.dimension_semantics<parallel>, #tpu.dimension_semantics<arbitrary>], iteration_bounds = array<i64: 1, 1>, scalar_prefetch = 0 : i64, scratch_operands = 1 : i64, tpu.core_type = #tpu.core_type<tc>, window_params = [{transform_indices = @transform_0, window_bounds = array<i64: 128, 128>}, {transform_indices = @transform_1, window_bounds = array<i64: 128, 128>}, {transform_indices = @transform_2, window_bounds = array<i64: 128, 128>}, {transform_indices = @transform_3, window_bounds = array<i64: 1, 1, 128>}, {transform_indices = @transform_4, window_bounds = array<i64: 1, 1, 128>}]} {
    %c0_i32 = arith.constant 0 : i32
    %0 = arith.cmpi eq, %arg1, %c0_i32 : i32
    %1 = arith.extui %0 : i1 to i32
    %c0_i32_0 = arith.constant 0 : i32
    %2 = arith.cmpi ne, %1, %c0_i32_0 : i32
    scf.if %2 {
      %cst_10 = arith.constant 0.000000e+00 : f32
      %12 = vector.broadcast %cst_10 : f32 to vector<128x128xf32>
      %c0_11 = arith.constant 0 : index
      %c0_12 = arith.constant 0 : index
      %13 = vector.load %arg7[%c0_11, %c0_12] : memref<128x128xf32, #tpu.memory_space<vmem>>, vector<128x128xf32>
      tpu.vector_store %arg7[%c0_11, %c0_12], %12 {strides = array<i32>} : memref<128x128xf32, #tpu.memory_space<vmem>>, vector<128x128xf32>,
    } else {
    }
    %c0 = arith.constant 0 : index
    %c0_1 = arith.constant 0 : index
    %3 = vector.load %arg7[%c0, %c0_1] : memref<128x128xf32, #tpu.memory_space<vmem>>, vector<128x128xf32>
    %c0_2 = arith.constant 0 : index
    %c0_3 = arith.constant 0 : index
    %4 = vector.load %arg2[%c0_2, %c0_3] : memref<128x128xf32, #tpu.memory_space<vmem>>, vector<128x128xf32>
    %c0_4 = arith.constant 0 : index
    %c0_5 = arith.constant 0 : index
    %5 = vector.load %arg3[%c0_4, %c0_5] : memref<128x128xf32, #tpu.memory_space<vmem>>, vector<128x128xf32>
    %cst = arith.constant dense<0.000000e+00> : vector<128x128xf32>
    %6 = tpu.matmul %4, %5, %cst {dimension_numbers = #tpu.dot_dimension_numbers<[1], [0], [0], [1], [0, 0, 1, 1], [], []>} : vector<128x128xf32>, vector<128x128xf32>, vector<128x128xf32> -> vector<128x128xf32>
    %7 = arith.addf %3, %6 : vector<128x128xf32>
    %c0_6 = arith.constant 0 : index
    %c0_7 = arith.constant 0 : index
    %8 = vector.load %arg7[%c0_6, %c0_7] : memref<128x128xf32, #tpu.memory_space<vmem>>, vector<128x128xf32>
    tpu.vector_store %arg7[%c0_6, %c0_7], %7 {strides = array<i32>} : memref<128x128xf32, #tpu.memory_space<vmem>>, vector<128x128xf32>,
    %c0_i32_8 = arith.constant 0 : i32
    %9 = arith.cmpi eq, %arg1, %c0_i32_8 : i32
    %10 = arith.extui %9 : i1 to i32
    %c0_i32_9 = arith.constant 0 : i32
    %11 = arith.cmpi ne, %10, %c0_i32_9 : i32
    scf.if %11 {
      %c0_10 = arith.constant 0 : index
      %c0_11 = arith.constant 0 : index
      %12 = vector.load %arg7[%c0_10, %c0_11] : memref<128x128xf32, #tpu.memory_space<vmem>>, vector<128x128xf32>
      %c0_12 = arith.constant 0 : index
      %c0_13 = arith.constant 0 : index
      %13 = vector.load %arg4[%c0_12, %c0_13] : memref<128x128xf32, #tpu.memory_space<vmem>>, vector<128x128xf32>
      tpu.vector_store %arg4[%c0_12, %c0_13], %12 {strides = array<i32>} : memref<128x128xf32, #tpu.memory_space<vmem>>, vector<128x128xf32>,
      %cst_14 = arith.constant dense<0.000000e+00> : vector<128xf32>
      %14 = vector.multi_reduction <add>, %12, %cst_14 [0] : vector<128x128xf32> to vector<128xf32>
      %15 = vector.shape_cast %14 : vector<128xf32> to vector<1x128xf32>
      %16 = vector.shape_cast %15 : vector<1x128xf32> to vector<1x1x128xf32>
      %c0_15 = arith.constant 0 : index
      %c0_16 = arith.constant 0 : index
      %c0_17 = arith.constant 0 : index
      %17 = vector.load %arg5[%c0_15, %c0_16, %c0_17] : memref<1x1x128xf32, #tpu.memory_space<vmem>>, vector<1x1x128xf32>
      tpu.vector_store %arg5[%c0_15, %c0_16, %c0_17], %16 {strides = array<i32>} : memref<1x1x128xf32, #tpu.memory_space<vmem>>, vector<1x1x128xf32>,
      %18 = arith.mulf %12, %12 : vector<128x128xf32>
      %cst_18 = arith.constant dense<0.000000e+00> : vector<128xf32>
      %19 = vector.multi_reduction <add>, %18, %cst_18 [0] : vector<128x128xf32> to vector<128xf32>
      %20 = vector.shape_cast %19 : vector<128xf32> to vector<1x128xf32>
      %21 = vector.shape_cast %20 : vector<1x128xf32> to vector<1x1x128xf32>
      %c0_19 = arith.constant 0 : index
      %c0_20 = arith.constant 0 : index
      %c0_21 = arith.constant 0 : index
      %22 = vector.load %arg6[%c0_19, %c0_20, %c0_21] : memref<1x1x128xf32, #tpu.memory_space<vmem>>, vector<1x1x128xf32>
      tpu.vector_store %arg6[%c0_19, %c0_20, %c0_21], %21 {strides = array<i32>} : memref<1x1x128xf32, #tpu.memory_space<vmem>>, vector<1x1x128xf32>,
    } else {
    }
    return
  }
  func.func @transform_0(%arg0: i32, %arg1: i32) -> (i32, i32) {
    %c0_i32 = arith.constant 0 : i32
    return %arg0, %arg1 : i32, i32
  }
  func.func @transform_1(%arg0: i32, %arg1: i32) -> (i32, i32) {
    %c0_i32 = arith.constant 0 : i32
    %c0_i32_0 = arith.constant 0 : i32
    return %arg1, %c0_i32 : i32, i32
  }
  func.func @transform_2(%arg0: i32, %arg1: i32) -> (i32, i32) {
    %c0_i32 = arith.constant 0 : i32
    %c0_i32_0 = arith.constant 0 : i32
    return %arg0, %c0_i32 : i32, i32
  }
  func.func @transform_3(%arg0: i32, %arg1: i32) -> (i32, i32, i32) {
    %c0_i32 = arith.constant 0 : i32
    %c0_i32_0 = arith.constant 0 : i32
    %c0_i32_1 = arith.constant 0 : i32
    return %arg0, %c0_i32, %c0_i32_0 : i32, i32, i32
  }
  func.func @transform_4(%arg0: i32, %arg1: i32) -> (i32, i32, i32) {
    %c0_i32 = arith.constant 0 : i32
    %c0_i32_0 = arith.constant 0 : i32
    %c0_i32_1 = arith.constant 0 : i32
    return %arg0, %c0_i32, %c0_i32_0 : i32, i32, i32
  }
}

</mosaic_0001>

<bundles_post_ra>
// kernel: tpu_custom_call.1
= control target key start
LH: loop header
LB: loop body
LE: loop exit
PB: predicated region body
PF: predicated region fallthrough
CT: control target
= control target key end

     0   :  { %10 = vsyncpa [#allocation4], 0  ;;  %s817_s0 = inlined_call_operand.hbm [shape: f32[128,128], index: 0, kind: input, shape index: {}]   ;;  %s818_s1 = inlined_call_operand.hbm [shape: f32[128,128], index: 1, kind: input, shape index: {}]   ;;  %s819_s2 = inlined_call_operand.hbm [shape: f32[128,128], index: 2, kind: output, shape index: {0}]   ;;  %s820_s3 = inlined_call_operand.hbm [shape: f32[1,1,128], index: 3, kind: output, shape index: {1}]   ;;  %s821_s4 = inlined_call_operand.hbm [shape: f32[1,1,128], index: 4, kind: output, shape index: {2}]  }
   0x1   :  { %11 = vsyncpa [#allocation7], 0 }
   0x2   :  { %12 = vsyncpa [#allocation5], 0 }
   0x3   :  { %13 = vsyncpa [#allocation10], 0  ;;  %s690_s15 = smov [#allocation3]   ;;  %s572_s19 = scalar_lea.hbm %s817_s0, 2048 }
   0x4   :  { %s19_s16 = sshll.u32 %s690_s15, 4  ;;  %p573_p0 = scmp.ne.s32.totalorder %s817_s0, %s572_s19  ;;  %s20_s16 = int_to_ptr.vmem [resolvable:$true] %s19_s16 }
   0x5   :  { %p576_p1 = scmp.lt.u32.totalorder %s572_s19, %s817_s0 }
   0x7   :  { %p578_p2 = pnand %p576_p1, %p573_p0 }
   0x9   :  { %581 = shalt.err (!%p578_p2)
}
   0xa   :  { %s582_s24 = scalar_lea.vmem %s20_s16, 2048  ;;  %p587_p4 = scmp.lt.s32.totalorder %s20_s16, %s20_s16 }
   0xb   :  { %p583_p3 = scmp.ne.s32.totalorder %s20_s16, %s582_s24  ;;  %p588_p5 = scmp.lt.s32.totalorder %s582_s24, %s582_s24 }
   0xd   :  { %p589_p6 = por %p588_p5, %p587_p4 }
   0xf   :  { %p590_p7 = pnand %p589_p6, %p583_p3 }
  0x11   :  { %593 = shalt.err (!%p590_p7)
}
  0x12   :  { %s691_s25 = smov 128   ;;  %s692_s26 = smov 8  }
  0x13   :  { %25 = dma.hbm_to_vmem [thread:$0]  %s817_s0, 2048, %s20_s16, [#allocation4], %s691_s25, %s691_s25, %s692_s26  }
  0x14   :  { %s693_s29 = smov [#allocation6]   ;;  %s594_s7 = scalar_lea.hbm %s818_s1, 2048 }
  0x15   :  { %s31_s30 = sshll.u32 %s693_s29, 4  ;;  %p595_p8 = scmp.ne.s32.totalorder %s818_s1, %s594_s7  ;;  %s32_s30 = int_to_ptr.vmem [resolvable:$true] %s31_s30 }
  0x16   :  { %p598_p9 = scmp.lt.u32.totalorder %s594_s7, %s818_s1 }
  0x18   :  { %p600_p10 = pnand %p598_p9, %p595_p8 }
  0x1a   :  { %603 = shalt.err (!%p600_p10)
}
  0x1b   :  { %s604_s12 = scalar_lea.vmem %s32_s30, 2048  ;;  %p609_p12 = scmp.lt.s32.totalorder %s32_s30, %s32_s30 }
  0x1c   :  { %p605_p11 = scmp.ne.s32.totalorder %s32_s30, %s604_s12  ;;  %p610_p13 = scmp.lt.s32.totalorder %s604_s12, %s604_s12 }
  0x1e   :  { %p611_p0 = por %p610_p13, %p609_p12 }
  0x20   :  { %p612_p1 = pnand %p611_p0, %p605_p11 }
  0x22   :  { %615 = shalt.err (!%p612_p1)
}
  0x23   :  { %37 = dma.hbm_to_vmem [thread:$0]  %s818_s1, 2048, %s32_s30, [#allocation7], %s691_s25, %s691_s25, %s692_s26  }
  0x24   :  { %682 = dma.done.wait [#allocation4], 2048  }
  0x25   :  { %683 = vsyncadd [#allocation4], 4294965248 }
  0x26   :  { %684 = dma.done.wait [#allocation7], 2048  }
  0x27   :  { %685 = vsyncadd [#allocation7], 4294965248  ;;  %v96_v0 = vld [vmem:[#allocation6] sm:$0xff]  ;;  %v97_v1 = vld [vmem:[#allocation6 + $0x8] sm:$0xff]  ;;  %s694_s1 = smov [#allocation8]  }
  0x28   :  { %v98_v2 = vld [vmem:[#allocation6 + $0x10] sm:$0xff]  ;;  %v517_v3 = vpack.c.bf16 %v97_v1, %v96_v0  ;;  %v99_v4 = vld [vmem:[#allocation6 + $0x18] sm:$0xff]  ;;  %v100_v6 = vld [vmem:[#allocation6 + $0x20] sm:$0xff]  ;;  %s389_s14 = sshll.u32 %s694_s1, 4  ;;  %s390_s14 = int_to_ptr.vmem [resolvable:$true] %s389_s14 }
  0x29   :  { %v521_v5 = vpack.c.bf16 %v99_v4, %v98_v2  ;;  %v101_v7 = vld [vmem:[#allocation6 + $0x28] sm:$0xff]  ;;  %v80_v9 = vld [vmem:[#allocation3] sm:$0xff]  ;;  %v102_v10 = vld [vmem:[#allocation6 + $0x30] sm:$0xff]  ;;  %s616_s15 = scalar_lea.vmem %s390_s14, 2048  ;;  %p621_p3 = scmp.lt.s32.totalorder %s390_s14, %s390_s14 }
  0x2a   :  { %518 = vmatprep.subr.bf16.mxu0 %v517_v3  ;;  %549 = vmatprep.subr.bf16.mxu1 %v517_v3  ;;  %v525_v8 = vpack.c.bf16 %v101_v7, %v100_v6  ;;  %v103_v11 = vld [vmem:[#allocation6 + $0x38] sm:$0xff]  ;;  %v88_v12 = vld [vmem:[#allocation3 + $0x40] sm:$0xff]  ;;  %v105_v15 = vld [vmem:[#allocation6 + $0x48] sm:$0xff]  ;;  %p617_p2 = scmp.ne.s32.totalorder %s390_s14, %s616_s15  ;;  %p622_p4 = scmp.lt.s32.totalorder %s616_s15, %s616_s15 }
  0x2b   :  { %520 = vmatpush3.bf16.msra.mxu0 %v517_v3  ;;  %557 = vmatpush3.bf16.msra.mxu1 %v517_v3  ;;  %v529_v13 = vpack.c.bf16 %v103_v11, %v102_v10  ;;  %v104_v14 = vld [vmem:[#allocation6 + $0x40] sm:$0xff]  ;;  %v106_v17 = vld [vmem:[#allocation6 + $0x50] sm:$0xff]  ;;  %v107_v18 = vld [vmem:[#allocation6 + $0x58] sm:$0xff] }
  0x2c   :  { %522 = vmatprep.subr.bf16.mxu0 %v521_v5  ;;  %550 = vmatprep.subr.bf16.mxu1 %v521_v5  ;;  %v533_v16 = vpack.c.bf16 %v105_v15, %v104_v14  ;;  %v537_v19 = vpack.c.bf16 %v107_v18, %v106_v17  ;;  %v108_v20 = vld [vmem:[#allocation6 + $0x60] sm:$0xff]  ;;  %v109_v21 = vld [vmem:[#allocation6 + $0x68] sm:$0xff]  ;;  %v110_v23 = vld [vmem:[#allocation6 + $0x70] sm:$0xff]  ;;  %p623_p5 = por %p622_p4, %p621_p3 }
  0x2d   :  { %493 = vmatprep.mubr.f32.mxu0 %v80_v9  ;;  %505 = vmatprep.mubr.f32.mxu1 %v88_v12  ;;  %v541_v22 = vpack.c.bf16 %v109_v21, %v108_v20  ;;  %v111_v24 = vld [vmem:[#allocation6 + $0x78] sm:$0xff]  ;;  %v81_v26 = vld [vmem:[#allocation3 + $0x8] sm:$0xff]  ;;  %v82_v28 = vld [vmem:[#allocation3 + $0x10] sm:$0xff] }
  0x2e   :  { %v545_v25 = vpack.c.bf16 %v111_v24, %v110_v23  ;;  %v89_v27 = vld [vmem:[#allocation3 + $0x48] sm:$0xff]  ;;  %v90_v29 = vld [vmem:[#allocation3 + $0x50] sm:$0xff]  ;;  %v83_v30 = vld [vmem:[#allocation3 + $0x18] sm:$0xff]  ;;  %p624_p6 = pnand %p623_p5, %p617_p2 }
  0x2f   :  { %524 = vmatpush3.bf16.msra.mxu0 %v521_v5  ;;  %558 = vmatpush3.bf16.msra.mxu1 %v521_v5  ;;  %v91_v31 = vld [vmem:[#allocation3 + $0x58] sm:$0xff]  ;;  %v84_v32 = vld [vmem:[#allocation3 + $0x20] sm:$0xff]  ;;  %v85_v34 = vld [vmem:[#allocation3 + $0x28] sm:$0xff] }
  0x30   :  { %526 = vmatprep.subr.bf16.mxu0 %v525_v8  ;;  %551 = vmatprep.subr.bf16.mxu1 %v525_v8  ;;  %v92_v33 = vld [vmem:[#allocation3 + $0x60] sm:$0xff]  ;;  %v93_v35 = vld [vmem:[#allocation3 + $0x68] sm:$0xff]  ;;  %v86_v36 = vld [vmem:[#allocation3 + $0x30] sm:$0xff] }
  0x31   :  { %v94_v37 = vld [vmem:[#allocation3 + $0x70] sm:$0xff]  ;;  %v87_v38 = vld [vmem:[#allocation3 + $0x38] sm:$0xff] }
  0x32   :  { %v95_v39 = vld [vmem:[#allocation3 + $0x78] sm:$0xff] }
  0x33   :  { %528 = vmatpush3.bf16.msra.mxu0 %v525_v8  ;;  %559 = vmatpush3.bf16.msra.mxu1 %v525_v8 }
  0x34   :  { %530 = vmatprep.subr.bf16.mxu0 %v529_v13  ;;  %552 = vmatprep.subr.bf16.mxu1 %v529_v13 }
  0x37   :  { %532 = vmatpush3.bf16.msra.mxu0 %v529_v13  ;;  %560 = vmatpush3.bf16.msra.mxu1 %v529_v13 }
  0x38   :  { %534 = vmatprep.subr.bf16.mxu0 %v533_v16  ;;  %553 = vmatprep.subr.bf16.mxu1 %v533_v16 }
  0x3b   :  { %536 = vmatpush3.bf16.msra.mxu0 %v533_v16  ;;  %561 = vmatpush3.bf16.msra.mxu1 %v533_v16 }
  0x3c   :  { %538 = vmatprep.subr.bf16.mxu0 %v537_v19  ;;  %554 = vmatprep.subr.bf16.mxu1 %v537_v19 }
  0x3f   :  { %540 = vmatpush3.bf16.msra.mxu0 %v537_v19  ;;  %562 = vmatpush3.bf16.msra.mxu1 %v537_v19 }
  0x40   :  { %542 = vmatprep.subr.bf16.mxu0 %v541_v22  ;;  %555 = vmatprep.subr.bf16.mxu1 %v541_v22 }
  0x43   :  { %544 = vmatpush3.bf16.msra.mxu0 %v541_v22  ;;  %563 = vmatpush3.bf16.msra.mxu1 %v541_v22 }
  0x44   :  { %546 = vmatprep.subr.bf16.mxu0 %v545_v25  ;;  %556 = vmatprep.subr.bf16.mxu1 %v545_v25 }
  0x47   :  { %548 = vmatpush3.bf16.msra.mxu0 %v545_v25  ;;  %564 = vmatpush3.bf16.msra.mxu1 %v545_v25 }
  0x4a   :  { %494 = vmatmul.mubr.f32.vlgmr.msra.gmra.mrb[0].mxu0 %v81_v26  ;;  %506 = vmatmul.mubr.f32.vlgmr.msra.gmra.mrb[0].mxu1 %v89_v27 }
  0x4b   :  { %496 = vmatprep.mubr.f32.mxu0 %v82_v28  ;;  %508 = vmatprep.mubr.f32.mxu1 %v90_v29 }
  0x4e   :  { %497 = vmatmul.mubr.f32.gmra.mrb[2].mxu0 %v83_v30  ;;  %509 = vmatmul.mubr.f32.gmra.mrb[2].mxu1 %v91_v31 }
  0x4f   :  { %499 = vmatprep.mubr.f32.mxu0 %v84_v32  ;;  %511 = vmatprep.mubr.f32.mxu1 %v92_v33 }
  0x52   :  { %500 = vmatmul.mubr.f32.gmra.mrb[4].mxu0 %v85_v34  ;;  %512 = vmatmul.mubr.f32.gmra.mrb[4].mxu1 %v93_v35 }
  0x53   :  { %502 = vmatprep.mubr.f32.mxu0 %v86_v36  ;;  %514 = vmatprep.mubr.f32.mxu1 %v94_v37 }
  0x56   :  { %503 = vmatmul.mubr.f32.gmra.mrb[6].mxu0 %v87_v38  ;;  %515 = vmatmul.mubr.f32.gmra.mrb[6].mxu1 %v95_v39 }
 0x11d   :  { %v495_v40 = vpop.f32.mrb[0].mxu0  ;;  %v752_v41 = vpop.f32.mrb[0].mxu1 }
 0x11e   :  { %309 = vst [vmem:[#allocation8 + $0x8] sm:$0xff] %v495_v40  ;;  %v347_v42 = vmul.f32 %v495_v40, %v495_v40  ;;  %v178_v43 = vpop.f32.mrb[1].mxu0  ;;  %317 = vst [vmem:[#allocation8 + $0x48] sm:$0xff] %v752_v41  ;;  %v755_v44 = vpop.f32.mrb[1].mxu1 }
 0x11f   :  { %308 = vst [vmem:[#allocation8] sm:$0xff] %v178_v43  ;;  %v324_v45 = vadd.f32 %v495_v40, %v178_v43  ;;  %v346_v46 = vmul.f32 %v178_v43, %v178_v43  ;;  %316 = vst [vmem:[#allocation8 + $0x40] sm:$0xff] %v755_v44 }
 0x121   :  { %v362_v47 = vadd.f32 %v347_v42, %v346_v46  ;;  %v498_v48 = vpop.f32.mrb[2].mxu0  ;;  %v758_v49 = vpop.f32.mrb[2].mxu1 }
 0x122   :  { %311 = vst [vmem:[#allocation8 + $0x18] sm:$0xff] %v498_v48  ;;  %v188_v50 = vpop.f32.mrb[3].mxu0  ;;  %319 = vst [vmem:[#allocation8 + $0x58] sm:$0xff] %v758_v49  ;;  %v228_v51 = vpop.f32.mrb[3].mxu1  ;;  %v349_v54 = vmul.f32 %v498_v48, %v498_v48 }
 0x123   :  { %310 = vst [vmem:[#allocation8 + $0x10] sm:$0xff] %v188_v50  ;;  %v325_v52 = vadd.f32 %v324_v45, %v188_v50  ;;  %v348_v53 = vmul.f32 %v188_v50, %v188_v50  ;;  %318 = vst [vmem:[#allocation8 + $0x50] sm:$0xff] %v228_v51 }
 0x125   :  { %v363_v55 = vadd.f32 %v362_v47, %v348_v53  ;;  %v501_v56 = vpop.f32.mrb[4].mxu0  ;;  %v326_v57 = vadd.f32 %v498_v48, %v325_v52  ;;  %v513_v58 = vpop.f32.mrb[4].mxu1 }
 0x126   :  { %313 = vst [vmem:[#allocation8 + $0x28] sm:$0xff] %v501_v56  ;;  %v198_v59 = vpop.f32.mrb[5].mxu0  ;;  %321 = vst [vmem:[#allocation8 + $0x68] sm:$0xff] %v513_v58  ;;  %v238_v60 = vpop.f32.mrb[5].mxu1  ;;  %v351_v0 = vmul.f32 %v501_v56, %v501_v56 }
 0x127   :  { %312 = vst [vmem:[#allocation8 + $0x20] sm:$0xff] %v198_v59  ;;  %v327_v61 = vadd.f32 %v326_v57, %v198_v59  ;;  %v350_v62 = vmul.f32 %v198_v59, %v198_v59  ;;  %v364_v63 = vadd.f32 %v363_v55, %v349_v54  ;;  %320 = vst [vmem:[#allocation8 + $0x60] sm:$0xff] %v238_v60 }
 0x129   :  { %v365_v1 = vadd.f32 %v364_v63, %v350_v62  ;;  %v504_v2 = vpop.f32.mrb[6].mxu0  ;;  %v328_v3 = vadd.f32 %v501_v56, %v327_v61  ;;  %v516_v4 = vpop.f32.mrb[6].mxu1 }
 0x12a   :  { %315 = vst [vmem:[#allocation8 + $0x38] sm:$0xff] %v504_v2  ;;  %v208_v5 = vpop.f32.mrb[7].mxu0  ;;  %323 = vst [vmem:[#allocation8 + $0x78] sm:$0xff] %v516_v4  ;;  %v248_v6 = vpop.f32.mrb[7].mxu1 }
 0x12b   :  { %314 = vst [vmem:[#allocation8 + $0x30] sm:$0xff] %v208_v5  ;;  %v329_v7 = vadd.f32 %v328_v3, %v208_v5  ;;  %v352_v8 = vmul.f32 %v208_v5, %v208_v5  ;;  %v366_v9 = vadd.f32 %v365_v1, %v351_v0  ;;  %322 = vst [vmem:[#allocation8 + $0x70] sm:$0xff] %v248_v6 }
 0x12c   :  { %627 = shalt.err (!%p624_p6)
}
 0x12d   :  { %s628_s18 = scalar_lea.hbm %s819_s2, 2048 }
 0x12e   :  { %p629_p7 = scmp.ne.s32.totalorder %s819_s2, %s628_s18  ;;  %p632_p8 = scmp.lt.u32.totalorder %s628_s18, %s819_s2 }
 0x130   :  { %p634_p9 = pnand %p632_p8, %p629_p7 }
 0x132   :  { %637 = shalt.err (!%p634_p9)
}
 0x133   :  { %395 = dma.vmem_to_hbm [thread:$0]  %s390_s14, 2048, %s819_s2, [#allocation5], %s691_s25, %s691_s25, %s692_s26   ;;  %v353_v10 = vmul.f32 %v504_v2, %v504_v2  ;;  %v330_v11 = vadd.f32 %v504_v2, %v329_v7  ;;  %v367_v12 = vadd.f32 %v366_v9, %v352_v8  ;;  %v354_v13 = vmul.f32 %v755_v44, %v755_v44 }
 0x134   :  { %v355_v16 = vmul.f32 %v752_v41, %v752_v41  ;;  %v356_v19 = vmul.f32 %v228_v51, %v228_v51  ;;  %v357_v22 = vmul.f32 %v758_v49, %v758_v49  ;;  %v358_v25 = vmul.f32 %v238_v60, %v238_v60  ;;  %s695_s2 = smov [#allocation9]   ;;  %s696_s26 = smov [#allocation11]  }
 0x135   :  { %v368_v14 = vadd.f32 %v367_v12, %v353_v10  ;;  %v331_v15 = vadd.f32 %v330_v11, %v755_v44  ;;  %v359_v28 = vmul.f32 %v513_v58, %v513_v58  ;;  %v360_v31 = vmul.f32 %v248_v6, %v248_v6  ;;  %s402_s25 = sshll.u32 %s695_s2, 4  ;;  %s412_s27 = sshll.u32 %s696_s26, 4  ;;  %s403_s25 = int_to_ptr.vmem [resolvable:$true] %s402_s25  ;;  %s785_s27 = int_to_ptr.vmem [resolvable:$true] %s412_s27 }
 0x136   :  { %v361_v34 = vmul.f32 %v516_v4, %v516_v4  ;;  %s638_s28 = scalar_lea.vmem %s403_s25, 16  ;;  %s642_s29 = scalar_lea.vmem %s403_s25, 32 }
 0x137   :  { %v369_v17 = vadd.f32 %v368_v14, %v354_v13  ;;  %v332_v18 = vadd.f32 %v752_v41, %v331_v15  ;;  %p639_p10 = scmp.ne.s32.totalorder %s403_s25, %s638_s28  ;;  %p643_p11 = scmp.lt.s32.totalorder %s403_s25, %s403_s25 }
 0x138   :  { %p644_p12 = scmp.lt.s32.totalorder %s642_s29, %s638_s28 }
 0x139   :  { %v333_v20 = vadd.f32 %v332_v18, %v228_v51  ;;  %v370_v21 = vadd.f32 %v369_v17, %v355_v16 }
 0x13a   :  { %p645_p13 = por %p644_p12, %p643_p11 }
 0x13b   :  { %v371_v23 = vadd.f32 %v370_v21, %v356_v19  ;;  %v334_v24 = vadd.f32 %v758_v49, %v333_v20 }
 0x13c   :  { %p646_p0 = pnand %p645_p13, %p639_p10 }
 0x13d   :  { %v335_v26 = vadd.f32 %v334_v24, %v238_v60  ;;  %v372_v27 = vadd.f32 %v371_v23, %v357_v22 }
 0x13f   :  { %v373_v29 = vadd.f32 %v372_v27, %v358_v25  ;;  %v336_v30 = vadd.f32 %v513_v58, %v335_v26 }
 0x141   :  { %v337_v32 = vadd.f32 %v336_v30, %v248_v6  ;;  %v374_v33 = vadd.f32 %v373_v29, %v359_v28 }
 0x143   :  { %v338_v35 = vadd.f32 %v516_v4, %v337_v32  ;;  %v375_v36 = vadd.f32 %v374_v33, %v360_v31 }
 0x145   :  { %v339_v37 = vrot.slane %v338_v35, 4  ;;  %v376_v38 = vadd.f32 %v375_v36, %v361_v34 }
 0x147   :  { %v340_v39 = vadd.f32 %v339_v37, %v338_v35  ;;  %v377_v40 = vrot.slane %v376_v38, 4 }
 0x149   :  { %v378_v41 = vadd.f32 %v377_v40, %v376_v38  ;;  %v341_v42 = vrot.slane %v340_v39, 2 }
 0x14b   :  { %v342_v43 = vadd.f32 %v341_v42, %v340_v39  ;;  %v379_v44 = vrot.slane %v378_v41, 2 }
 0x14d   :  { %v343_v45 = vrot.slane %v342_v43, 1  ;;  %v380_v46 = vadd.f32 %v379_v44, %v378_v41 }
 0x14f   :  { %v344_v47 = vadd.f32 %v343_v45, %v342_v43  ;;  %v381_v48 = vrot.slane %v380_v46, 1 }
 0x151   :  { %345 = vst [vmem:[#allocation9] sm:$0x1] %v344_v47  ;;  %v382_v49 = vadd.f32 %v381_v48, %v380_v46 }
 0x152   :  { %649 = shalt.err (!%p646_p0)
}
 0x153   :  { %s650_s6 = scalar_lea.hbm %s820_s3, 16 }
 0x154   :  { %p651_p1 = scmp.ne.s32.totalorder %s820_s3, %s650_s6  ;;  %p654_p2 = scmp.lt.u32.totalorder %s650_s6, %s820_s3 }
 0x156   :  { %p656_p3 = pnand %p654_p2, %p651_p1 }
 0x158   :  { %659 = shalt.err (!%p656_p3)
}
 0x159   :  { %405 = dma.vmem_to_hbm [thread:$0]  %s403_s25, 16, %s820_s3, [#allocation10]   ;;  %383 = vst [vmem:[#allocation11] sm:$0x1] %v382_v49 }
 0x15a   :  { %s660_s0 = scalar_lea.vmem %s785_s27, 16  ;;  %s664_s13 = scalar_lea.vmem %s785_s27, 32 }
 0x15b   :  { %p661_p4 = scmp.ne.s32.totalorder %s785_s27, %s660_s0  ;;  %p665_p5 = scmp.lt.s32.totalorder %s785_s27, %s785_s27 }
 0x15c   :  { %p666_p6 = scmp.lt.s32.totalorder %s664_s13, %s660_s0 }
 0x15e   :  { %p667_p7 = por %p666_p6, %p665_p5 }
 0x160   :  { %p668_p8 = pnand %p667_p7, %p661_p4 }
 0x162   :  { %671 = shalt.err (!%p668_p8)
}
 0x163   :  { %s672_s15 = scalar_lea.hbm %s821_s4, 16 }
 0x164   :  { %p673_p9 = scmp.ne.s32.totalorder %s821_s4, %s672_s15  ;;  %p676_p10 = scmp.lt.u32.totalorder %s672_s15, %s821_s4 }
 0x166   :  { %p678_p11 = pnand %p676_p10, %p673_p9 }
 0x168   :  { %681 = shalt.err (!%p678_p11)
}
 0x169   :  { %415 = dma.vmem_to_hbm [thread:$0]  %s785_s27, 16, %s821_s4, [#allocation10]  }
 0x16a   :  { %686 = dma.done.wait [#allocation5], 2048  }
 0x16b   :  { %687 = vsyncadd [#allocation5], 4294965248 }
 0x16c   :  { %688 = dma.done.wait [#allocation10], 32  }
 0x16d   :  { %689 = vsyncadd [#allocation10], 4294967264 }
 0x16e   :  { %425 = vsyncpa [#allocation4], 1 }
 0x16f   :  { %426 = vsyncpa [#allocation7], 1 }
 0x170   :  { %427 = vsyncpa [#allocation5], 1 }
 0x171   :  { %428 = vsyncpa [#allocation10], 1 }

</bundles_post_ra>
